<compile_context>
chip_gen: v7x
topology: tpu7x:2x2x1
jax: 0.10.0
libtpu: 0.0.40
codegen_flags: <defaults>
</compile_context>

<pallas_src>
import numpy as np
import jax
import jax.numpy as jnp
from jax.experimental import pallas as pl
from jax.experimental.pallas import tpu as pltpu

# ---------------- Model hyper-parameters (the argparse.Namespace fields) ----------------
SIGNAL_WINDOW_SIZE = 16      # args.signal_window_size (power of 2)
TIME_SLICE_INTERVAL = 1      # args.mf_time_slice_interval (power of 2)
MAXPOOL_SIZE = 2             # args.mf_maxpool_size (1, 2 or 4)
SUBWINDOW_SIZE = 8           # args.subwindow_size
NEG_SLOPE = 0.02             # args.mf_negative_slope
DROPOUT_RATE = 0.1           # args.mf_dropout_rate (identity at inference)
NUM_FILTERS = 10             # args.dwt_num_filters
DWT_WAVELET = "haar"         # args.dwt_wavelet
DWT_LEVEL = -1               # args.dwt_level (-1 -> max level)

TIME_POINTS = SIGNAL_WINDOW_SIZE // TIME_SLICE_INTERVAL
NBINS = TIME_POINTS // SUBWINDOW_SIZE          # subwindow_nbins
SSW = SUBWINDOW_SIZE
POOL = MAXPOOL_SIZE
HP = 8 // POOL                                  # pooled spatial height
WP = 8 // POOL                                  # pooled spatial width
PP = HP * WP                                    # pooled spatial size (flattened)

K_TOTAL = NBINS * SSW * PP                      # fused matmul K (= 256 for default config)
NOUT = NBINS * NUM_FILTERS                      # real output width (= 20)
OUT_PAD = max(128, ((NOUT + 127) // 128) * 128) # lane-dense output width (= 128)
TILE_N_MAX = 512                                # batch rows (matmul M) per grid step

assert K_TOTAL % 128 == 0, "fused contraction dim must be lane-aligned (multiple of 128)"


def _haar_max_level(n: int) -> int:
    # pywt.dwt_max_level(n, 'haar') == floor(log2(n / (filter_len - 1))) with filter_len=2
    return int(np.floor(np.log2(n)))


DWT_J = _haar_max_level(SSW) if DWT_LEVEL == -1 else DWT_LEVEL


def _haar_dwt_matrix(n: int, levels: int) -> np.ndarray:
    """Linear operator of the J-level Haar DWT (pytorch_wavelets DWT1DForward semantics,
    even lengths -> no padding).  Rows ordered like the forward(): [lo_J, hi_1, ..., hi_J]."""
    inv_sqrt2 = 1.0 / np.sqrt(2.0)

    def analysis(m):
        A = np.zeros((m // 2, m), dtype=np.float64)
        D = np.zeros((m // 2, m), dtype=np.float64)
        for k in range(m // 2):
            A[k, 2 * k] = inv_sqrt2
            A[k, 2 * k + 1] = inv_sqrt2
            D[k, 2 * k] = inv_sqrt2
            D[k, 2 * k + 1] = -inv_sqrt2
        return A, D

    lo = np.eye(n, dtype=np.float64)
    his = []
    cur = n
    for _ in range(levels):
        A, D = analysis(cur)
        his.append(D @ lo)
        lo = A @ lo
        cur //= 2
    return np.vstack([lo] + his)


W_DWT = _haar_dwt_matrix(SSW, DWT_J).astype(np.float32)   # (dwt_output_length, SSW)
LDWT = W_DWT.shape[0]                                      # dwt_output_length


# ------------------------------- Pallas kernel -------------------------------
def _dwt_feature_kernel(x_ref, w_ref, b_ref, out_ref):
    # x_ref:   (TILE_N, K_TOTAL) bf16  -- pooled samples, (bin, time, pooled-space) flattened
    # w_ref:   (K_TOTAL, OUT_PAD) bf16 -- block-diagonal fused (DWT o Conv3d) weights, zero-padded
    # b_ref:   (1, OUT_PAD) f32        -- zero-padded bias
    # out_ref: (TILE_N, OUT_PAD) f32
    acc = jnp.dot(x_ref[...], w_ref[...], preferred_element_type=jnp.float32)
    acc = acc + b_ref[...]                                   # f32 epilogue (bias)
    out_ref[...] = jnp.where(acc >= 0.0, acc, NEG_SLOPE * acc).astype(out_ref.dtype)


# --------------------------------- Wrapper -----------------------------------
@jax.jit
def dwt_feature_model_forward(x, conv_w, conv_b):
    """x: (N, 1, signal_window_size, 8, 8) float32  (PyTorch NCDHW)
       conv_w: (NBINS, F, LDWT, HP, WP), conv_b: (NBINS, F)
       returns: (N, NBINS * F)  == torch.flatten(relu(dropout(dwt_features)), 1)"""
    N = x.shape[0]

    # ---- glue in XLA: time slicing, 2x2 spatial max-pool, lane-dense flattening ----
    xs = x[:, 0, ::TIME_SLICE_INTERVAL]                                  # (N, T, 8, 8)
    xp = xs.reshape(N, TIME_POINTS, HP, POOL, WP, POOL).max(axis=(3, 5)) # (N, T, HP, WP)
    x_flat = xp.reshape(N, K_TOTAL).astype(jnp.bfloat16)                 # (N, 256)

    # ---- fold the multi-level DWT into the Conv3d weights (exact, both are linear) ----
    # w_eff[i, (s,h,w), f] = sum_t W_DWT[t, s] * conv_w[i, f, t, h, w]
    w_eff = jnp.einsum('ts,ifthw->ishwf', jnp.asarray(W_DWT), conv_w,
                       precision=jax.lax.Precision.HIGHEST)              # (NBINS,SSW,HP,WP,F)
    w_eff = w_eff.reshape(NBINS, SSW * PP, NUM_FILTERS)
    # block-diagonal over the subwindow bins -> one matmul for the whole forward
    eye = jnp.eye(NBINS, dtype=w_eff.dtype)
    w_bd = jnp.einsum('ij,ikf->ikjf', eye, w_eff).reshape(K_TOTAL, NOUT)
    w_pad = jnp.pad(w_bd, ((0, 0), (0, OUT_PAD - NOUT))).astype(jnp.bfloat16)
    b_pad = jnp.pad(conv_b.reshape(1, NOUT).astype(jnp.float32),
                    ((0, 0), (0, OUT_PAD - NOUT)))                       # (1, 128) f32

    # ---- batch tiling: many samples per grid step, sublane-aligned, pad the batch ----
    tile_n = TILE_N_MAX if N >= TILE_N_MAX else max(8, ((N + 7) // 8) * 8)
    n_pad = ((N + tile_n - 1) // tile_n) * tile_n
    if n_pad != N:
        x_flat = jnp.pad(x_flat, ((0, n_pad - N), (0, 0)))

    out = pl.pallas_call(
        _dwt_feature_kernel,
        out_shape=jax.ShapeDtypeStruct((n_pad, OUT_PAD), jnp.float32),
        grid_spec=pltpu.PrefetchScalarGridSpec(
            num_scalar_prefetch=0,
            grid=(n_pad // tile_n,),
            in_specs=[
                pl.BlockSpec((tile_n, K_TOTAL), lambda n: (n, 0)),
                pl.BlockSpec((K_TOTAL, OUT_PAD), lambda n: (0, 0)),
                pl.BlockSpec((1, OUT_PAD), lambda n: (0, 0)),
            ],
            out_specs=pl.BlockSpec((tile_n, OUT_PAD), lambda n: (n, 0)),
        ),
        compiler_params=pltpu.CompilerParams(
            dimension_semantics=("parallel",),
        ),
    )(x_flat, w_pad, b_pad)

    # drop batch padding and the lane padding; torch.flatten(..., 1) ordering is (bin, filter)
    return out[:N, :NOUT]


# ------------------------- Pure-JAX reference (for check) -------------------------
def reference_forward(x, conv_w, conv_b):
    N = x.shape[0]
    xs = x[:, :, ::TIME_SLICE_INTERVAL]                                        # (N,1,T,8,8)
    xp = xs.reshape(N, 1, TIME_POINTS, HP, POOL, WP, POOL).max(axis=(4, 6))    # (N,1,T,HP,WP)
    W = jnp.asarray(W_DWT)
    feats = []
    for i in range(NBINS):
        xsw = xp[:, 0, i * SSW:(i + 1) * SSW]                                  # (N,SSW,HP,WP)
        dwt = jnp.einsum('ts,nshw->nthw', W, xsw,
                         precision=jax.lax.Precision.HIGHEST)                  # (N,LDWT,HP,WP)
        f = jnp.einsum('nthw,fthw->nf', dwt, conv_w[i],
                       precision=jax.lax.Precision.HIGHEST) + conv_b[i]        # (N,F)
        feats.append(f)
    feats = jnp.stack(feats, axis=1)                                           # (N,NBINS,F)
    feats = jnp.where(feats >= 0, feats, NEG_SLOPE * feats)
    return feats.reshape(N, NBINS * NUM_FILTERS)


if __name__ == "__main__":
    key = jax.random.PRNGKey(0)

    # deterministic synthetic Conv3d parameters (shapes from the module's __init__)
    pkey = jax.random.PRNGKey(1)
    k1, k2 = jax.random.split(pkey)
    fan_in = LDWT * HP * WP
    bound = 1.0 / np.sqrt(fan_in)
    conv_w = jax.random.uniform(k1, (NBINS, NUM_FILTERS, LDWT, HP, WP),
                                jnp.float32, -bound, bound)
    conv_b = jax.random.uniform(k2, (NBINS, NUM_FILTERS), jnp.float32, -bound, bound)

    # small main check (N=2) plus a multi-grid-step / padded-batch check (N=1100)
    for N in (2, 1100):
        x = jax.random.normal(jax.random.fold_in(key, N),
                              (N, 1, SIGNAL_WINDOW_SIZE, 8, 8), dtype=jnp.float32)
        out = jax.block_until_ready(dwt_feature_model_forward(x, conv_w, conv_b))
        ref = reference_forward(x, conv_w, conv_b)
        assert out.shape == (N, NBINS * NUM_FILTERS), out.shape
        np.testing.assert_allclose(np.asarray(out), np.asarray(ref), rtol=1e-2, atol=1e-2)

    print("KERNEL_OK")
</pallas_src>

<mosaic_0001>
module attributes {stable_mosaic.version = 11 : i64} {
  func.func @_dwt_feature_kernel(%arg0: i32, %arg1: memref<8x256xbf16, #tpu.memory_space<vmem>>, %arg2: memref<256x128xbf16, #tpu.memory_space<vmem>>, %arg3: memref<1x128xf32, #tpu.memory_space<vmem>>, %arg4: memref<8x128xf32, #tpu.memory_space<vmem>>) attributes {dimension_semantics = [#tpu.dimension_semantics<parallel>], iteration_bounds = array<i64: 1>, scalar_prefetch = 0 : i64, scratch_operands = 0 : i64, tpu.core_type = #tpu.core_type<tc>, window_params = [{transform_indices = @transform_0, window_bounds = array<i64: 8, 256>}, {pipeline_mode = #tpu.pipeline_mode<synchronous>, transform_indices = @transform_1, window_bounds = array<i64: 256, 128>}, {pipeline_mode = #tpu.pipeline_mode<synchronous>, transform_indices = @transform_2, window_bounds = array<i64: 1, 128>}, {transform_indices = @transform_3, window_bounds = array<i64: 8, 128>}]} {
    %c0 = arith.constant 0 : index
    %c0_0 = arith.constant 0 : index
    %0 = vector.load %arg1[%c0, %c0_0] : memref<8x256xbf16, #tpu.memory_space<vmem>>, vector<8x256xbf16>
    %c0_1 = arith.constant 0 : index
    %c0_2 = arith.constant 0 : index
    %1 = vector.load %arg2[%c0_1, %c0_2] : memref<256x128xbf16, #tpu.memory_space<vmem>>, vector<256x128xbf16>
    %cst = arith.constant dense<0.000000e+00> : vector<8x128xf32>
    %2 = tpu.matmul %0, %1, %cst {dimension_numbers = #tpu.dot_dimension_numbers<[1], [0], [0], [1], [0, 0, 1, 1], [], []>} : vector<8x256xbf16>, vector<256x128xbf16>, vector<8x128xf32> -> vector<8x128xf32>
    %c0_3 = arith.constant 0 : index
    %c0_4 = arith.constant 0 : index
    %3 = vector.load %arg3[%c0_3, %c0_4] : memref<1x128xf32, #tpu.memory_space<vmem>>, vector<1x128xf32>
    %4 = vector.broadcast %3 : vector<1x128xf32> to vector<8x128xf32>
    %5 = arith.addf %2, %4 : vector<8x128xf32>
    %cst_5 = arith.constant 0.000000e+00 : f32
    %6 = vector.broadcast %cst_5 : f32 to vector<8x128xf32>
    %7 = arith.cmpf oge, %5, %6 : vector<8x128xf32>
    %cst_6 = arith.constant 2.000000e-02 : f32
    %8 = vector.broadcast %cst_6 : f32 to vector<8x128xf32>
    %9 = arith.mulf %8, %5 : vector<8x128xf32>
    %10 = arith.select %7, %5, %9 : vector<8x128xi1>, vector<8x128xf32>
    %c0_7 = arith.constant 0 : index
    %c0_8 = arith.constant 0 : index
    %11 = vector.load %arg4[%c0_7, %c0_8] : memref<8x128xf32, #tpu.memory_space<vmem>>, vector<8x128xf32>
    tpu.vector_store %arg4[%c0_7, %c0_8], %10 {strides = array<i32>} : memref<8x128xf32, #tpu.memory_space<vmem>>, vector<8x128xf32>,
    return
  }
  func.func @transform_0(%arg0: i32) -> (i32, i32) {
    %c0_i32 = arith.constant 0 : i32
    %c0_i32_0 = arith.constant 0 : i32
    return %arg0, %c0_i32 : i32, i32
  }
  func.func @transform_1(%arg0: i32) -> (i32, i32) {
    %c0_i32 = arith.constant 0 : i32
    %c0_i32_0 = arith.constant 0 : i32
    %c0_i32_1 = arith.constant 0 : i32
    return %c0_i32, %c0_i32_0 : i32, i32
  }
  func.func @transform_2(%arg0: i32) -> (i32, i32) {
    %c0_i32 = arith.constant 0 : i32
    %c0_i32_0 = arith.constant 0 : i32
    %c0_i32_1 = arith.constant 0 : i32
    return %c0_i32, %c0_i32_0 : i32, i32
  }
  func.func @transform_3(%arg0: i32) -> (i32, i32) {
    %c0_i32 = arith.constant 0 : i32
    %c0_i32_0 = arith.constant 0 : i32
    return %arg0, %c0_i32 : i32, i32
  }
}

</mosaic_0001>

<bundles_post_ra>
// kernel: dwt_feature_model_forward.1
= control target key start
LH: loop header
LB: loop body
LE: loop exit
PB: predicated region body
PF: predicated region fallthrough
CT: control target
= control target key end

     0   :  { %s342_s1 = inlined_call_operand.vmem [shape: bf16[256,128], index: 1, kind: input, shape index: {}]   ;;  %s343_s0 = inlined_call_operand.vmem [shape: bf16[8,256], index: 0, kind: input, shape index: {}]   ;;  %s344_s2 = inlined_call_operand.vmem [shape: f32[1,128], index: 2, kind: input, shape index: {}]   ;;  %s345_s3 = inlined_call_operand.vmem [shape: f32[8,128], index: 3, kind: output, shape index: {}]  }
   0x1   :  { %v247_v0 = vld [vmem:[%s342_s1 + $0x40] sm:$0xff]   ;;  %v249_v2 = vld [vmem:[%s342_s1 + $0x48] sm:$0xff]   ;;  %v251_v4 = vld [vmem:[%s342_s1 + $0x50] sm:$0xff]  }
   0x2   :  { %v248_v1 = vld [vmem:[%s342_s1] sm:$0xff]   ;;  %225 = vmatprep.subr.bf16.mxu0 %v247_v0  ;;  %v250_v3 = vld [vmem:[%s342_s1 + $0x8] sm:$0xff]   ;;  %v252_v5 = vld [vmem:[%s342_s1 + $0x10] sm:$0xff]  }
   0x3   :  { %226 = vmatpush3.bf16.msra.mxu0 %v248_v1  ;;  %v253_v6 = vld [vmem:[%s342_s1 + $0x58] sm:$0xff]   ;;  %v255_v8 = vld [vmem:[%s342_s1 + $0x60] sm:$0xff]   ;;  %v257_v10 = vld [vmem:[%s342_s1 + $0x68] sm:$0xff]  }
   0x4   :  { %227 = vmatprep.subr.bf16.mxu0 %v249_v2  ;;  %v254_v7 = vld [vmem:[%s342_s1 + $0x18] sm:$0xff]   ;;  %v256_v9 = vld [vmem:[%s342_s1 + $0x20] sm:$0xff]   ;;  %v258_v13 = vld [vmem:[%s342_s1 + $0x28] sm:$0xff]  }
   0x5   :  { %v15_v11 = vld [vmem:[%s343_s0] sm:$0xff]  ;;  %v259_v14 = vld [vmem:[%s342_s1 + $0x70] sm:$0xff]   ;;  %v261_v16 = vld [vmem:[%s342_s1 + $0x78] sm:$0xff]  }
   0x6   :  { %v208_v12 = vcombine.high %v15_v11, %v15_v11  ;;  %v260_v15 = vld [vmem:[%s342_s1 + $0x30] sm:$0xff]   ;;  %v262_v17 = vld [vmem:[%s342_s1 + $0x38] sm:$0xff]   ;;  %v207_v18 = vcombine.low %v15_v11, %v15_v11  ;;  %v206_v20 = vld [vmem:[%s344_s2] ss:$0 sm:$0xff] }
   0x7   :  { %228 = vmatpush3.bf16.msra.mxu0 %v250_v3 }
   0x8   :  { %229 = vmatprep.subr.bf16.mxu0 %v251_v4  ;;  %190 = vmatprep.mubr.bf16.mxu0 %v208_v12 }
   0xb   :  { %230 = vmatpush3.bf16.msra.mxu0 %v252_v5 }
   0xc   :  { %231 = vmatprep.subr.bf16.mxu0 %v253_v6 }
   0xf   :  { %232 = vmatpush3.bf16.msra.mxu0 %v254_v7 }
  0x10   :  { %233 = vmatprep.subr.bf16.mxu0 %v255_v8 }
  0x13   :  { %234 = vmatpush3.bf16.msra.mxu0 %v256_v9 }
  0x14   :  { %235 = vmatprep.subr.bf16.mxu0 %v257_v10 }
  0x17   :  { %236 = vmatpush3.bf16.msra.mxu0 %v258_v13 }
  0x18   :  { %237 = vmatprep.subr.bf16.mxu0 %v259_v14 }
  0x1b   :  { %238 = vmatpush3.bf16.msra.mxu0 %v260_v15 }
  0x1c   :  { %239 = vmatprep.subr.bf16.mxu0 %v261_v16 }
  0x1f   :  { %240 = vmatpush3.bf16.msra.mxu0 %v262_v17 }
  0x22   :  { %191 = vmatmul.mubr.bf16.vlgmr.msra.gmra.mrb[0].mxu0 %v207_v18 }
  0xf5   :  { %v241_v19 = vpop.f32.mrb[0].mxu0 }
  0xf6   :  { %v242_v21 = vpop.f32.mrb[1].mxu0 }
  0xf7   :  { %v243_v22 = vadd.f32 %v242_v21, %v241_v19  ;;  %v244_v23 = vpop.f32.mrb[2].mxu0 }
  0xf8   :  { %v245_v24 = vpop.f32.mrb[3].mxu0 }
  0xf9   :  { %v193_v25 = vadd.f32 %v243_v22, %v206_v20 }
  0xfb   :  { %vm198_vm0 = vcmp.ge.f32.partialorder %v193_v25, 0.0  ;;  %v199_v26 = vmul.f32 0.02, %v193_v25 }
  0xfd   :  { %v200_v27 = vsel %vm198_vm0, %v193_v25, %v199_v26 }
  0xfe   :  { %201 = vst [vmem:[%s345_s3] sm:$0xff] %v200_v27 }

</bundles_post_ra>
